<compile_context>
chip_gen: v6e
topology: v6e:2x2x1
jax: 0.10.0
libtpu: 0.0.40
codegen_flags: <defaults>
</compile_context>

<pallas_src>
from functools import partial

import jax
import jax.numpy as jnp
from jax.experimental import pallas as pl
from jax.experimental.pallas import tpu as pltpu


# ----------------------------------------------------------------------------
# Pallas kernel: apply `fn` elementwise to the tile resident in VMEM.
# ----------------------------------------------------------------------------
def _lambda_kernel(fn, compute_dtype, x_ref, o_ref):
    x = x_ref[...]
    if compute_dtype is not None and x.dtype != compute_dtype:
        # v5e has no native bf16 VPU/EUP path: compute in f32, cast back.
        y = fn(x.astype(compute_dtype))
    else:
        y = fn(x)
    o_ref[...] = y.astype(o_ref.dtype)


def make_pallas_lambda(fn, *, flops_per_element=4, transcendentals_per_element=1):
    """Return a callable equivalent to Lambda(fn).forward for elementwise fn."""

    TARGET_BLOCK_BYTES = 2 * 1024 * 1024  # ~2 MiB blocks: >=85% of HBM roofline,
                                          # 4x that (double-buffered in+out) fits
                                          # comfortably in scoped VMEM on all chips.

    def apply(x):
        orig_shape = x.shape
        dtype = x.dtype
        n = x.size
        itemsize = jnp.dtype(dtype).itemsize

        # Minimum sublane tile per dtype packing; f32 compute for 16-bit floats.
        if itemsize >= 4:
            sublane = 8
        elif itemsize == 2:
            sublane = 16
        else:
            sublane = 32
        compute_dtype = (
            jnp.float32
            if (itemsize == 2 and jnp.issubdtype(dtype, jnp.floating))
            else None
        )

        flat = jnp.ravel(x)  # row-major flatten: free (no copy) in XLA.

        # Pick the widest lane width (multiple of 128) that divides n exactly so
        # no pad / slice of the full tensor is needed.
        lane = None
        for cand in (2048, 1024, 512, 256, 128):
            if n % cand == 0:
                lane = cand
                break
        padded = lane is None
        if padded:
            # TODO(synk): rare ragged fallback (n not a multiple of 128) still
            # materializes a padded copy; could split main/tail instead.
            lane = 128
            n_pad = pl.cdiv(n, lane) * lane
            flat = jnp.pad(flat, (0, n_pad - n))
        else:
            n_pad = n

        rows = n_pad // lane
        x2d = flat.reshape(rows, lane)

        # Row tile sized for ~TARGET_BLOCK_BYTES, multiple of the dtype sublane
        # minimum; if it covers all rows the block equals the full dim (exempt
        # from the (8,128) divisibility rule).
        rt = TARGET_BLOCK_BYTES // (lane * itemsize)
        rt = max(sublane, min(1024, (rt // sublane) * sublane))
        row_tile = min(rt, rows)

        steps = pl.cdiv(rows, row_tile)
        # v7x has 2 TensorCores: prefer an even number of parallel grid steps.
        if steps > 1 and steps % 2 == 1 and row_tile > sublane:
            alt = pl.cdiv(pl.cdiv(rows, steps + 1), sublane) * sublane
            row_tile = max(sublane, min(alt, rows))
            steps = pl.cdiv(rows, row_tile)

        cost = pl.CostEstimate(
            flops=flops_per_element * n_pad,
            transcendentals=transcendentals_per_element * n_pad,
            bytes_accessed=2 * n_pad * itemsize,
        )

        out2d = pl.pallas_call(
            partial(_lambda_kernel, fn, compute_dtype),
            out_shape=jax.ShapeDtypeStruct((rows, lane), dtype),
            grid_spec=pltpu.PrefetchScalarGridSpec(
                num_scalar_prefetch=0,
                grid=(steps,),
                in_specs=[pl.BlockSpec((row_tile, lane), lambda i: (i, 0))],
                out_specs=pl.BlockSpec((row_tile, lane), lambda i: (i, 0)),
            ),
            compiler_params=pltpu.CompilerParams(
                dimension_semantics=("parallel",),
                vmem_limit_bytes=32 * 1024 * 1024,
            ),
            cost_estimate=cost,
        )(x2d)

        if padded:
            return out2d.reshape(-1)[:n].reshape(orig_shape)
        return out2d.reshape(orig_shape)

    return apply


# ----------------------------------------------------------------------------
# Demo / self-test
# ----------------------------------------------------------------------------
if __name__ == "__main__":
    # Representative fn wrapped by Lambda in the lie-transformer code paths:
    # swish / SiLU, x * sigmoid(x).
    swish = lambda x: x * jax.nn.sigmoid(x)
    pallas_swish = make_pallas_lambda(
        swish, flops_per_element=4, transcendentals_per_element=1
    )

    key = jax.random.PRNGKey(0)
    k1, k2, k3 = jax.random.split(key, 3)

    # 1) NCHW f32 input (batch=2, channels=4, spatial=16x16); element count is
    #    an exact multiple of the lane width -> no pad / slice path.
    x1 = jax.random.normal(k1, (2, 4, 16, 16), dtype=jnp.float32)
    o1 = jax.block_until_ready(pallas_swish(x1))
    assert o1.shape == x1.shape and o1.dtype == x1.dtype
    assert jnp.allclose(o1, swish(x1), atol=1e-6, rtol=1e-6)

    # 2) bf16 input: in-kernel f32 compute, 16-row sublane packing respected.
    x2 = jax.random.normal(k2, (2, 3, 16, 16), dtype=jnp.bfloat16)
    o2 = jax.block_until_ready(pallas_swish(x2))
    ref2 = swish(x2.astype(jnp.float32)).astype(jnp.bfloat16)
    assert o2.dtype == jnp.bfloat16
    assert jnp.allclose(
        o2.astype(jnp.float32), ref2.astype(jnp.float32), atol=2e-2, rtol=2e-2
    )

    # 3) ragged element count (not a multiple of 128) exercises the fallback.
    x3 = jax.random.normal(k3, (5, 7, 9), dtype=jnp.float32)
    o3 = jax.block_until_ready(pallas_swish(x3))
    assert jnp.allclose(o3, swish(x3), atol=1e-6, rtol=1e-6)

    print("KERNEL_OK")
</pallas_src>

<mosaic_0001>
module attributes {stable_mosaic.version = 11 : i64} {
  func.func @_lambda_kernel(%arg0: i32, %arg1: memref<1x2048xf32, #tpu.memory_space<vmem>>, %arg2: memref<1x2048xf32, #tpu.memory_space<vmem>>) attributes {dimension_semantics = [#tpu.dimension_semantics<parallel>], iteration_bounds = array<i64: 1>, scalar_prefetch = 0 : i64, scratch_operands = 0 : i64, tpu.core_type = #tpu.core_type<tc>, window_params = [{transform_indices = @transform_0, window_bounds = array<i64: 1, 2048>}, {transform_indices = @transform_1, window_bounds = array<i64: 1, 2048>}]} {
    %c0 = arith.constant 0 : index
    %c0_0 = arith.constant 0 : index
    %0 = vector.load %arg1[%c0, %c0_0] : memref<1x2048xf32, #tpu.memory_space<vmem>>, vector<1x2048xf32>
    %1 = arith.negf %0 : vector<1x2048xf32>
    %2 = math.exp %1 : vector<1x2048xf32>
    %cst = arith.constant 1.000000e+00 : f32
    %3 = vector.broadcast %cst : f32 to vector<1x2048xf32>
    %4 = arith.addf %3, %2 : vector<1x2048xf32>
    %5 = arith.divf %3, %4 : vector<1x2048xf32>
    %6 = arith.mulf %0, %5 : vector<1x2048xf32>
    %c0_1 = arith.constant 0 : index
    %c0_2 = arith.constant 0 : index
    %7 = vector.load %arg2[%c0_1, %c0_2] : memref<1x2048xf32, #tpu.memory_space<vmem>>, vector<1x2048xf32>
    tpu.vector_store %arg2[%c0_1, %c0_2], %6 {strides = array<i32>} : memref<1x2048xf32, #tpu.memory_space<vmem>>, vector<1x2048xf32>,
    return
  }
  func.func @transform_0(%arg0: i32) -> (i32, i32) {
    %c0_i32 = arith.constant 0 : i32
    %c0_i32_0 = arith.constant 0 : i32
    return %arg0, %c0_i32 : i32, i32
  }
  func.func @transform_1(%arg0: i32) -> (i32, i32) {
    %c0_i32 = arith.constant 0 : i32
    %c0_i32_0 = arith.constant 0 : i32
    return %arg0, %c0_i32 : i32, i32
  }
}

</mosaic_0001>

<bundles_post_ra>
// kernel: tpu_custom_call.1
= control target key start
LH: loop header
LB: loop body
LE: loop exit
PB: predicated region body
PF: predicated region fallthrough
CT: control target
= control target key end

     0   :  { %6 = vsyncpa [#allocation3], 0  ;;  %s128_s0 = inlined_call_operand.hbm [shape: f32[1,2048], index: 0, kind: input, shape index: {}]   ;;  %s129_s1 = inlined_call_operand.hbm [shape: f32[1,2048], index: 1, kind: output, shape index: {}]  }
   0x1   :  { %7 = vsyncpa [#allocation4], 0  ;;  %s110_s6 = smov [#allocation2]  }
   0x2   :  { %s14_s7 = sshll.u32 %s110_s6, 4  ;;  %s15_s7 = int_to_ptr.vmem [resolvable:$true] %s14_s7 }
   0x3   :  { %s74_s8 = scalar_lea.vmem %s15_s7, 256  ;;  %p79_p1 = scmp.lt.s32.totalorder %s15_s7, %s15_s7 }
   0x4   :  { %p75_p0 = scmp.ne.s32.totalorder %s15_s7, %s74_s8  ;;  %p80_p2 = scmp.lt.s32.totalorder %s74_s8, %s74_s8 }
   0x6   :  { %p81_p3 = por %p80_p2, %p79_p1 }
   0x8   :  { %p82_p4 = pnand %p81_p3, %p75_p0 }
   0xa   :  { %85 = shalt.err (!%p82_p4)
}
   0xb   :  { %17 = dma.hbm_to_vmem [thread:$0]  %s128_s0, 256, %s15_s7, [#allocation3]  }
   0xc   :  { %106 = dma.done.wait [#allocation3], 256  }
   0xd   :  { %107 = vsyncadd [#allocation3], 4294967040  ;;  %v21_v0 = vld [vmem:[#allocation2] sm:$0xff]  ;;  %v22_v1 = vld [vmem:[#allocation2 + $0x8] sm:$0xff]  ;;  %s111_s11 = smov [#allocation5]  }
   0xe   :  { %v54_v2 = vmul.f32 -1.442695, %v21_v0  ;;  %v55_v3 = vmul.f32 -1.442695, %v22_v1  ;;  %s45_s12 = sshll.u32 %s111_s11, 4  ;;  %s46_s12 = int_to_ptr.vmem [resolvable:$true] %s45_s12 }
   0xf   :  { %s86_s0 = scalar_lea.vmem %s46_s12, 256  ;;  %p91_p6 = scmp.lt.s32.totalorder %s46_s12, %s46_s12 }
  0x10   :  { %58 = vpow2.f32 %v54_v2  ;;  %p87_p5 = scmp.ne.s32.totalorder %s46_s12, %s86_s0  ;;  %p92_p7 = scmp.lt.s32.totalorder %s86_s0, %s86_s0 }
  0x11   :  { %60 = vpow2.f32 %v55_v3 }
  0x12   :  { %p93_p8 = por %p92_p7, %p91_p6 }
  0x14   :  { %p94_p9 = pnand %p93_p8, %p87_p5 }
  0x1d   :  { %v59_v4 = vpop.eup %58 }
  0x1e   :  { %v61_v5 = vpop.eup %60  ;;  %v29_v6 = vadd.f32 1.0, %v59_v4 }
  0x1f   :  { %v30_v7 = vadd.f32 1.0, %v61_v5 }
  0x20   :  { %62 = vrcp.f32 %v29_v6 }
  0x21   :  { %64 = vrcp.f32 %v30_v7 }
  0x2d   :  { %v63_v8 = vpop.eup %62 }
  0x2e   :  { %v65_v9 = vpop.eup %64  ;;  %v35_v10 = vmul.f32 %v63_v8, %v21_v0 }
  0x2f   :  { %v36_v11 = vmul.f32 %v65_v9, %v22_v1 }
  0x30   :  { %37 = vst [vmem:[#allocation5] sm:$0xff] %v35_v10 }
  0x31   :  { %38 = vst [vmem:[#allocation5 + $0x8] sm:$0xff] %v36_v11 }
  0x32   :  { %97 = shalt.err (!%p94_p9)
}
  0x33   :  { %48 = dma.vmem_to_hbm [thread:$0]  %s46_s12, 256, %s129_s1, [#allocation4]  }
  0x34   :  { %108 = dma.done.wait [#allocation4], 256  }
  0x35   :  { %109 = vsyncadd [#allocation4], 4294967040 }
  0x36   :  { %52 = vsyncpa [#allocation3], 1 }
  0x37   :  { %53 = vsyncpa [#allocation4], 1 }

</bundles_post_ra>
